<compile_context>
chip_gen: v6e
topology: v6e:2x2x1
jax: 0.10.0
libtpu: 0.0.40
codegen_flags: <defaults>
</compile_context>

<pallas_src>
import functools

import jax
import jax.numpy as jnp
from jax.experimental import pallas as pl
from jax.experimental.pallas import tpu as pltpu

H1 = 10      # Linear(1, 10)
H2 = 100     # Linear(10, 100)
HPAD = 128   # padded hidden width (lane-dense)


def _round_up(x: int, m: int) -> int:
    return ((x + m - 1) // m) * m


# ----------------------------- kernel ---------------------------------------
def mask_kernel(x_ref, p1_ref, w2_ref, w3_ref, b3_ref, o_ref, *,
                binary: bool, pack: int, param_dtype):
    # p1 (f32, 8x128, zero padded): row0 = w1, row1 = b1, row2 = b2
    w1 = p1_ref[0:1, :]                # (1, 128)
    b1 = p1_ref[1:2, :]                # (1, 128)
    b2 = p1_ref[2:3, :]                # (1, 128)
    w2 = w2_ref[...]                   # (128, 128) in param_dtype (bf16 default)
    b3 = b3_ref[0:1, :]                # (1, N_OUT) f32, b3 tiled per lane group

    acc = None
    for j in range(pack):
        # chunk j handles samples with (sample % pack) == j
        xj = x_ref[:, j:j + 1]                                  # (tile_r, 1) f32
        # layer 1: K=1 contraction -> VPU outer product, stays in f32
        h1 = jnp.maximum(xj * w1 + b1, 0.0)                     # (tile_r, 128)
        # layer 2: bf16 MXU dot, f32 accumulation, f32 bias + ReLU
        h2 = jnp.maximum(
            jnp.dot(h1.astype(param_dtype), w2,
                    preferred_element_type=jnp.float32) + b2, 0.0)
        # layer 3: w3 copy for chunk j already sits at lane offset j*mask_size,
        # so the per-chunk logits land directly in their packed lane group.
        zj = jnp.dot(h2.astype(param_dtype), w3_ref[j],
                     preferred_element_type=jnp.float32)        # (tile_r, N_OUT)
        acc = zj if acc is None else acc + zj

    z = acc + b3
    if binary:
        # round(sigmoid(z)) == 1 iff z > 0 (round-half-to-even gives 0 at z==0),
        # so skip the EUP sigmoid entirely on the binary path.
        y = (z > 0.0).astype(jnp.float32)
    else:
        y = jax.nn.sigmoid(z)
    o_ref[...] = y.astype(o_ref.dtype)                           # lane-dense store


# ------------------------ parameter packing ----------------------------------
def pack_params(params, mask_size: int, pack: int, n_out: int, param_dtype):
    """Pack the 6 small tensors into 4 zero-padded lane-dense slabs."""
    w1, b1, w2, b2, w3, b3 = params

    p1 = jnp.zeros((8, HPAD), jnp.float32)
    p1 = p1.at[0, :H1].set(w1.reshape(H1).astype(jnp.float32))
    p1 = p1.at[1, :H1].set(b1.reshape(H1).astype(jnp.float32))
    p1 = p1.at[2, :H2].set(b2.reshape(H2).astype(jnp.float32))

    w2p = jnp.zeros((HPAD, HPAD), jnp.float32)
    w2p = w2p.at[:H1, :H2].set(w2.astype(jnp.float32)).astype(param_dtype)

    # One copy of w3 per chunk, shifted to its packed lane group; b3 tiled alike.
    w3p = jnp.zeros((pack, HPAD, n_out), jnp.float32)
    b3t = jnp.zeros((8, n_out), jnp.float32)
    for j in range(pack):
        lo = j * mask_size
        w3p = w3p.at[j, :H2, lo:lo + mask_size].set(w3.astype(jnp.float32))
        b3t = b3t.at[0, lo:lo + mask_size].set(
            b3.reshape(mask_size).astype(jnp.float32))
    w3p = w3p.astype(param_dtype)
    return p1, w2p, w3p, b3t


# ------------------------------ wrapper --------------------------------------
def mask_forward(x, params, binary: bool = True, tile_b: int = 4096,
                 param_dtype=jnp.bfloat16):
    """Runs Mask.forward as a single batch-tiled Pallas call."""
    w3 = params[4]
    mask_size = w3.shape[1]

    if mask_size <= 128 and 128 % mask_size == 0:
        pack = 128 // mask_size         # samples packed per 128-lane output row
        n_out = 128
    else:
        pack = 1                        # general fallback: lane-padded output
        n_out = _round_up(mask_size, 128)

    batch = x.shape[0]
    # Minimal padding: packed rows rounded up to a multiple of 8 only.
    r_total = max(8, _round_up(pl.cdiv(batch, pack), 8))
    tile_r_target = max(8, _round_up(max(tile_b // pack, 8), 8))
    n_steps = pl.cdiv(r_total, tile_r_target)
    if n_steps == 1 and r_total >= 16:
        n_steps = 2                     # >=2 parallel steps -> both TCs on v7x
    tile_r = _round_up(pl.cdiv(r_total, n_steps), 8)
    r_pad = n_steps * tile_r
    b_pad = r_pad * pack

    xf = x.reshape(-1).astype(jnp.float32)
    if b_pad != batch:
        xf = jnp.pad(xf, (0, b_pad - batch))
    x_pad = xf.reshape(r_pad, pack)     # sample s -> row s//pack, column s%pack

    p1, w2p, w3p, b3t = pack_params(params, mask_size, pack, n_out, param_dtype)
    kernel = functools.partial(mask_kernel, binary=binary, pack=pack,
                               param_dtype=param_dtype)

    out = pl.pallas_call(
        kernel,
        out_shape=jax.ShapeDtypeStruct((r_pad, n_out), jnp.float32),
        grid=(n_steps,),
        in_specs=[
            # x: tiled over packed batch rows (double-buffered across steps)
            pl.BlockSpec((tile_r, pack), lambda i: (i, 0)),
            # params: constant index_maps -> resident in VMEM across the grid
            pl.BlockSpec((8, HPAD), lambda i: (0, 0)),
            pl.BlockSpec((HPAD, HPAD), lambda i: (0, 0)),
            pl.BlockSpec((pack, HPAD, n_out), lambda i: (0, 0, 0)),
            pl.BlockSpec((8, n_out), lambda i: (0, 0)),
        ],
        out_specs=pl.BlockSpec((tile_r, n_out), lambda i: (i, 0)),
        compiler_params=pltpu.CompilerParams(
            dimension_semantics=("parallel",),      # shard batch over 2 TCs (v7x)
            vmem_limit_bytes=32 * 1024 * 1024),
    )(x_pad, p1, w2p, w3p, b3t)

    if pack > 1:
        # Packed layout unpacks with a *contiguous* reshape (no data movement).
        y = out.reshape(b_pad, mask_size)
        return y if b_pad == batch else y[:batch]
    # Fallback path (mask_size does not divide 128): slice off lane padding.
    return out[:batch, :mask_size]


# --------------------------- init / reference --------------------------------
def init_params(key, mask_size: int):
    """Deterministic synthetic parameters matching the nn.Sequential shapes.

    Weights are stored (in_features, out_features): y = x @ W + b
    (PyTorch weights must be transposed into this layout when imported)."""
    k1, k2, k3, k4, k5, k6 = jax.random.split(key, 6)
    w1 = jax.random.normal(k1, (1, H1), jnp.float32) * 0.5
    b1 = jax.random.normal(k2, (1, H1), jnp.float32) * 0.1
    w2 = jax.random.normal(k3, (H1, H2), jnp.float32) * 0.3
    b2 = jax.random.normal(k4, (1, H2), jnp.float32) * 0.1
    w3 = jax.random.normal(k5, (H2, mask_size), jnp.float32) * 0.1
    b3 = jax.random.normal(k6, (1, mask_size), jnp.float32) * 0.1
    return (w1, b1, w2, b2, w3, b3)


def reference_forward(x, params, binary: bool = True):
    """Pure-JAX reference of the PyTorch forward, for validation."""
    w1, b1, w2, b2, w3, b3 = params
    h1 = jnp.maximum(x @ w1 + b1, 0.0)
    h2 = jnp.maximum(h1 @ w2 + b2, 0.0)
    y = jax.nn.sigmoid(h2 @ w3 + b3)
    return jnp.round(y) if binary else y


# ------------------------------- demo ----------------------------------------
if __name__ == "__main__":
    # base_model.linear: in_features=8, out_features=4  ->  mask_size = 32
    IN_FEATURES, OUT_FEATURES = 8, 4
    MASK_SIZE = IN_FEATURES * OUT_FEATURES
    BATCH = 2

    key = jax.random.PRNGKey(0)
    k_params, k_x = jax.random.split(key)
    params = init_params(k_params, MASK_SIZE)
    x = jax.random.normal(k_x, (BATCH, 1), jnp.float32)

    # default (bf16 dots): binary and soft paths
    out_bin = mask_forward(x, params, binary=True)
    jax.block_until_ready(out_bin)
    out_soft = mask_forward(x, params, binary=False)
    jax.block_until_ready(out_soft)

    ref_bin = reference_forward(x, params, binary=True)
    ref_soft = reference_forward(x, params, binary=False)

    assert out_bin.shape == (BATCH, MASK_SIZE)
    assert out_soft.shape == (BATCH, MASK_SIZE)
    # bf16 matmuls -> loose tolerance on the soft path; binary compared only
    # where the reference is not right at the 0.5 decision boundary.
    assert jnp.allclose(out_soft, ref_soft, atol=3e-2)
    safe = jnp.abs(ref_soft - 0.5) > 3e-2
    assert bool(jnp.all(jnp.where(safe, out_bin == ref_bin, True)))
    assert bool(jnp.all((out_bin == 0.0) | (out_bin == 1.0)))

    # f32-parameter run exercises the same kernel structure at full precision.
    out_soft_f32 = mask_forward(x, params, binary=False, param_dtype=jnp.float32)
    out_bin_f32 = mask_forward(x, params, binary=True, param_dtype=jnp.float32)
    jax.block_until_ready(out_soft_f32)
    assert jnp.allclose(out_soft_f32, ref_soft, atol=1e-5)
    safe32 = jnp.abs(ref_soft - 0.5) > 1e-5
    assert bool(jnp.all(jnp.where(safe32, out_bin_f32 == ref_bin, True)))

    print("KERNEL_OK")
</pallas_src>

<mosaic_0001>
module attributes {stable_mosaic.version = 11 : i64} {
  func.func @mask_kernel(%arg0: i32, %arg1: memref<8x4xf32, #tpu.memory_space<vmem>>, %arg2: memref<8x128xf32, #tpu.memory_space<vmem>>, %arg3: memref<128x128xbf16, #tpu.memory_space<vmem>>, %arg4: memref<4x128x128xbf16, #tpu.memory_space<vmem>>, %arg5: memref<8x128xf32, #tpu.memory_space<vmem>>, %arg6: memref<8x128xf32, #tpu.memory_space<vmem>>) attributes {dimension_semantics = [#tpu.dimension_semantics<parallel>], iteration_bounds = array<i64: 1>, scalar_prefetch = 0 : i64, scratch_operands = 0 : i64, tpu.core_type = #tpu.core_type<tc>, window_params = [{transform_indices = @transform_0, window_bounds = array<i64: 8, 4>}, {pipeline_mode = #tpu.pipeline_mode<synchronous>, transform_indices = @transform_1, window_bounds = array<i64: 8, 128>}, {pipeline_mode = #tpu.pipeline_mode<synchronous>, transform_indices = @transform_2, window_bounds = array<i64: 128, 128>}, {pipeline_mode = #tpu.pipeline_mode<synchronous>, transform_indices = @transform_3, window_bounds = array<i64: 4, 128, 128>}, {pipeline_mode = #tpu.pipeline_mode<synchronous>, transform_indices = @transform_4, window_bounds = array<i64: 8, 128>}, {transform_indices = @transform_5, window_bounds = array<i64: 8, 128>}]} {
    %c0 = arith.constant 0 : index
    %c0_0 = arith.constant 0 : index
    %0 = vector.load %arg2[%c0, %c0_0] : memref<8x128xf32, #tpu.memory_space<vmem>>, vector<1x128xf32>
    %c1 = arith.constant 1 : index
    %c0_1 = arith.constant 0 : index
    %1 = vector.load %arg2[%c1, %c0_1] : memref<8x128xf32, #tpu.memory_space<vmem>>, vector<1x128xf32>
    %c2 = arith.constant 2 : index
    %c0_2 = arith.constant 0 : index
    %2 = vector.load %arg2[%c2, %c0_2] : memref<8x128xf32, #tpu.memory_space<vmem>>, vector<1x128xf32>
    %c0_3 = arith.constant 0 : index
    %c0_4 = arith.constant 0 : index
    %3 = vector.load %arg3[%c0_3, %c0_4] : memref<128x128xbf16, #tpu.memory_space<vmem>>, vector<128x128xbf16>
    %c0_5 = arith.constant 0 : index
    %c0_6 = arith.constant 0 : index
    %4 = vector.load %arg5[%c0_5, %c0_6] : memref<8x128xf32, #tpu.memory_space<vmem>>, vector<1x128xf32>
    %c0_7 = arith.constant 0 : index
    %c0_8 = arith.constant 0 : index
    %5 = vector.load %arg1[%c0_7, %c0_8] : memref<8x4xf32, #tpu.memory_space<vmem>>, vector<8x1xf32>
    %6 = vector.broadcast %5 : vector<8x1xf32> to vector<8x128xf32>
    %7 = vector.broadcast %0 : vector<1x128xf32> to vector<8x128xf32>
    %8 = arith.mulf %6, %7 : vector<8x128xf32>
    %9 = vector.broadcast %1 : vector<1x128xf32> to vector<8x128xf32>
    %10 = arith.addf %8, %9 : vector<8x128xf32>
    %cst = arith.constant 0.000000e+00 : f32
    %11 = vector.broadcast %cst : f32 to vector<8x128xf32>
    %12 = arith.maximumf %10, %11 : vector<8x128xf32>
    %13 = arith.truncf %12 : vector<8x128xf32> to vector<8x128xbf16>
    %cst_9 = arith.constant dense<0.000000e+00> : vector<8x128xf32>
    %14 = tpu.matmul %13, %3, %cst_9 {dimension_numbers = #tpu.dot_dimension_numbers<[1], [0], [0], [1], [0, 0, 1, 1], [], []>} : vector<8x128xbf16>, vector<128x128xbf16>, vector<8x128xf32> -> vector<8x128xf32>
    %15 = vector.broadcast %2 : vector<1x128xf32> to vector<8x128xf32>
    %16 = arith.addf %14, %15 : vector<8x128xf32>
    %cst_10 = arith.constant 0.000000e+00 : f32
    %17 = vector.broadcast %cst_10 : f32 to vector<8x128xf32>
    %18 = arith.maximumf %16, %17 : vector<8x128xf32>
    %19 = arith.truncf %18 : vector<8x128xf32> to vector<8x128xbf16>
    %c0_11 = arith.constant 0 : index
    %c0_12 = arith.constant 0 : index
    %c0_13 = arith.constant 0 : index
    %20 = vector.load %arg4[%c0_11, %c0_12, %c0_13] : memref<4x128x128xbf16, #tpu.memory_space<vmem>>, vector<1x128x128xbf16>
    %21 = vector.shape_cast %20 : vector<1x128x128xbf16> to vector<128x128xbf16>
    %cst_14 = arith.constant dense<0.000000e+00> : vector<8x128xf32>
    %22 = tpu.matmul %19, %21, %cst_14 {dimension_numbers = #tpu.dot_dimension_numbers<[1], [0], [0], [1], [0, 0, 1, 1], [], []>} : vector<8x128xbf16>, vector<128x128xbf16>, vector<8x128xf32> -> vector<8x128xf32>
    %c0_15 = arith.constant 0 : index
    %c1_16 = arith.constant 1 : index
    %23 = vector.load %arg1[%c0_15, %c1_16] : memref<8x4xf32, #tpu.memory_space<vmem>>, vector<8x1xf32>
    %24 = vector.broadcast %23 : vector<8x1xf32> to vector<8x128xf32>
    %25 = vector.broadcast %0 : vector<1x128xf32> to vector<8x128xf32>
    %26 = arith.mulf %24, %25 : vector<8x128xf32>
    %27 = vector.broadcast %1 : vector<1x128xf32> to vector<8x128xf32>
    %28 = arith.addf %26, %27 : vector<8x128xf32>
    %cst_17 = arith.constant 0.000000e+00 : f32
    %29 = vector.broadcast %cst_17 : f32 to vector<8x128xf32>
    %30 = arith.maximumf %28, %29 : vector<8x128xf32>
    %31 = arith.truncf %30 : vector<8x128xf32> to vector<8x128xbf16>
    %cst_18 = arith.constant dense<0.000000e+00> : vector<8x128xf32>
    %32 = tpu.matmul %31, %3, %cst_18 {dimension_numbers = #tpu.dot_dimension_numbers<[1], [0], [0], [1], [0, 0, 1, 1], [], []>} : vector<8x128xbf16>, vector<128x128xbf16>, vector<8x128xf32> -> vector<8x128xf32>
    %33 = vector.broadcast %2 : vector<1x128xf32> to vector<8x128xf32>
    %34 = arith.addf %32, %33 : vector<8x128xf32>
    %cst_19 = arith.constant 0.000000e+00 : f32
    %35 = vector.broadcast %cst_19 : f32 to vector<8x128xf32>
    %36 = arith.maximumf %34, %35 : vector<8x128xf32>
    %37 = arith.truncf %36 : vector<8x128xf32> to vector<8x128xbf16>
    %c1_20 = arith.constant 1 : index
    %c0_21 = arith.constant 0 : index
    %c0_22 = arith.constant 0 : index
    %38 = vector.load %arg4[%c1_20, %c0_21, %c0_22] : memref<4x128x128xbf16, #tpu.memory_space<vmem>>, vector<1x128x128xbf16>
    %39 = vector.shape_cast %38 : vector<1x128x128xbf16> to vector<128x128xbf16>
    %cst_23 = arith.constant dense<0.000000e+00> : vector<8x128xf32>
    %40 = tpu.matmul %37, %39, %cst_23 {dimension_numbers = #tpu.dot_dimension_numbers<[1], [0], [0], [1], [0, 0, 1, 1], [], []>} : vector<8x128xbf16>, vector<128x128xbf16>, vector<8x128xf32> -> vector<8x128xf32>
    %41 = arith.addf %22, %40 : vector<8x128xf32>
    %c0_24 = arith.constant 0 : index
    %c2_25 = arith.constant 2 : index
    %42 = vector.load %arg1[%c0_24, %c2_25] : memref<8x4xf32, #tpu.memory_space<vmem>>, vector<8x1xf32>
    %43 = vector.broadcast %42 : vector<8x1xf32> to vector<8x128xf32>
    %44 = vector.broadcast %0 : vector<1x128xf32> to vector<8x128xf32>
    %45 = arith.mulf %43, %44 : vector<8x128xf32>
    %46 = vector.broadcast %1 : vector<1x128xf32> to vector<8x128xf32>
    %47 = arith.addf %45, %46 : vector<8x128xf32>
    %cst_26 = arith.constant 0.000000e+00 : f32
    %48 = vector.broadcast %cst_26 : f32 to vector<8x128xf32>
    %49 = arith.maximumf %47, %48 : vector<8x128xf32>
    %50 = arith.truncf %49 : vector<8x128xf32> to vector<8x128xbf16>
    %cst_27 = arith.constant dense<0.000000e+00> : vector<8x128xf32>
    %51 = tpu.matmul %50, %3, %cst_27 {dimension_numbers = #tpu.dot_dimension_numbers<[1], [0], [0], [1], [0, 0, 1, 1], [], []>} : vector<8x128xbf16>, vector<128x128xbf16>, vector<8x128xf32> -> vector<8x128xf32>
    %52 = vector.broadcast %2 : vector<1x128xf32> to vector<8x128xf32>
    %53 = arith.addf %51, %52 : vector<8x128xf32>
    %cst_28 = arith.constant 0.000000e+00 : f32
    %54 = vector.broadcast %cst_28 : f32 to vector<8x128xf32>
    %55 = arith.maximumf %53, %54 : vector<8x128xf32>
    %56 = arith.truncf %55 : vector<8x128xf32> to vector<8x128xbf16>
    %c2_29 = arith.constant 2 : index
    %c0_30 = arith.constant 0 : index
    %c0_31 = arith.constant 0 : index
    %57 = vector.load %arg4[%c2_29, %c0_30, %c0_31] : memref<4x128x128xbf16, #tpu.memory_space<vmem>>, vector<1x128x128xbf16>
    %58 = vector.shape_cast %57 : vector<1x128x128xbf16> to vector<128x128xbf16>
    %cst_32 = arith.constant dense<0.000000e+00> : vector<8x128xf32>
    %59 = tpu.matmul %56, %58, %cst_32 {dimension_numbers = #tpu.dot_dimension_numbers<[1], [0], [0], [1], [0, 0, 1, 1], [], []>} : vector<8x128xbf16>, vector<128x128xbf16>, vector<8x128xf32> -> vector<8x128xf32>
    %60 = arith.addf %41, %59 : vector<8x128xf32>
    %c0_33 = arith.constant 0 : index
    %c3 = arith.constant 3 : index
    %61 = vector.load %arg1[%c0_33, %c3] : memref<8x4xf32, #tpu.memory_space<vmem>>, vector<8x1xf32>
    %62 = vector.broadcast %61 : vector<8x1xf32> to vector<8x128xf32>
    %63 = vector.broadcast %0 : vector<1x128xf32> to vector<8x128xf32>
    %64 = arith.mulf %62, %63 : vector<8x128xf32>
    %65 = vector.broadcast %1 : vector<1x128xf32> to vector<8x128xf32>
    %66 = arith.addf %64, %65 : vector<8x128xf32>
    %cst_34 = arith.constant 0.000000e+00 : f32
    %67 = vector.broadcast %cst_34 : f32 to vector<8x128xf32>
    %68 = arith.maximumf %66, %67 : vector<8x128xf32>
    %69 = arith.truncf %68 : vector<8x128xf32> to vector<8x128xbf16>
    %cst_35 = arith.constant dense<0.000000e+00> : vector<8x128xf32>
    %70 = tpu.matmul %69, %3, %cst_35 {dimension_numbers = #tpu.dot_dimension_numbers<[1], [0], [0], [1], [0, 0, 1, 1], [], []>} : vector<8x128xbf16>, vector<128x128xbf16>, vector<8x128xf32> -> vector<8x128xf32>
    %71 = vector.broadcast %2 : vector<1x128xf32> to vector<8x128xf32>
    %72 = arith.addf %70, %71 : vector<8x128xf32>
    %cst_36 = arith.constant 0.000000e+00 : f32
    %73 = vector.broadcast %cst_36 : f32 to vector<8x128xf32>
    %74 = arith.maximumf %72, %73 : vector<8x128xf32>
    %75 = arith.truncf %74 : vector<8x128xf32> to vector<8x128xbf16>
    %c3_37 = arith.constant 3 : index
    %c0_38 = arith.constant 0 : index
    %c0_39 = arith.constant 0 : index
    %76 = vector.load %arg4[%c3_37, %c0_38, %c0_39] : memref<4x128x128xbf16, #tpu.memory_space<vmem>>, vector<1x128x128xbf16>
    %77 = vector.shape_cast %76 : vector<1x128x128xbf16> to vector<128x128xbf16>
    %cst_40 = arith.constant dense<0.000000e+00> : vector<8x128xf32>
    %78 = tpu.matmul %75, %77, %cst_40 {dimension_numbers = #tpu.dot_dimension_numbers<[1], [0], [0], [1], [0, 0, 1, 1], [], []>} : vector<8x128xbf16>, vector<128x128xbf16>, vector<8x128xf32> -> vector<8x128xf32>
    %79 = arith.addf %60, %78 : vector<8x128xf32>
    %80 = vector.broadcast %4 : vector<1x128xf32> to vector<8x128xf32>
    %81 = arith.addf %79, %80 : vector<8x128xf32>
    %cst_41 = arith.constant 0.000000e+00 : f32
    %82 = vector.broadcast %cst_41 : f32 to vector<8x128xf32>
    %83 = arith.cmpf ogt, %81, %82 : vector<8x128xf32>
    %84 = arith.extui %83 : vector<8x128xi1> to vector<8x128xi32>
    %85 = arith.sitofp %84 : vector<8x128xi32> to vector<8x128xf32>
    %c0_42 = arith.constant 0 : index
    %c0_43 = arith.constant 0 : index
    %86 = vector.load %arg6[%c0_42, %c0_43] : memref<8x128xf32, #tpu.memory_space<vmem>>, vector<8x128xf32>
    tpu.vector_store %arg6[%c0_42, %c0_43], %85 {strides = array<i32>} : memref<8x128xf32, #tpu.memory_space<vmem>>, vector<8x128xf32>,
    return
  }
  func.func @transform_0(%arg0: i32) -> (i32, i32) {
    %c0_i32 = arith.constant 0 : i32
    %c0_i32_0 = arith.constant 0 : i32
    return %arg0, %c0_i32 : i32, i32
  }
  func.func @transform_1(%arg0: i32) -> (i32, i32) {
    %c0_i32 = arith.constant 0 : i32
    %c0_i32_0 = arith.constant 0 : i32
    %c0_i32_1 = arith.constant 0 : i32
    return %c0_i32, %c0_i32_0 : i32, i32
  }
  func.func @transform_2(%arg0: i32) -> (i32, i32) {
    %c0_i32 = arith.constant 0 : i32
    %c0_i32_0 = arith.constant 0 : i32
    %c0_i32_1 = arith.constant 0 : i32
    return %c0_i32, %c0_i32_0 : i32, i32
  }
  func.func @transform_3(%arg0: i32) -> (i32, i32, i32) {
    %c0_i32 = arith.constant 0 : i32
    %c0_i32_0 = arith.constant 0 : i32
    %c0_i32_1 = arith.constant 0 : i32
    %c0_i32_2 = arith.constant 0 : i32
    return %c0_i32, %c0_i32_0, %c0_i32_1 : i32, i32, i32
  }
  func.func @transform_4(%arg0: i32) -> (i32, i32) {
    %c0_i32 = arith.constant 0 : i32
    %c0_i32_0 = arith.constant 0 : i32
    %c0_i32_1 = arith.constant 0 : i32
    return %c0_i32, %c0_i32_0 : i32, i32
  }
  func.func @transform_5(%arg0: i32) -> (i32, i32) {
    %c0_i32 = arith.constant 0 : i32
    %c0_i32_0 = arith.constant 0 : i32
    return %arg0, %c0_i32 : i32, i32
  }
}

</mosaic_0001>

<bundles_post_ra>
// kernel: tpu_custom_call.1
= control target key start
LH: loop header
LB: loop body
LE: loop exit
PB: predicated region body
PF: predicated region fallthrough
CT: control target
= control target key end

     0   :  { %10 = vsyncpa [#allocation3], 0  ;;  %s1389_s0 = inlined_call_operand.vmem [shape: f32[8,4], index: 0, kind: input, shape index: {}]   ;;  %s1390_s1 = inlined_call_operand.vmem [shape: f32[8,128], index: 1, kind: input, shape index: {}]   ;;  %s1391_s2 = inlined_call_operand.hbm [shape: bf16[128,128], index: 2, kind: input, shape index: {}]   ;;  %s1392_s3 = inlined_call_operand.hbm [shape: bf16[4,128,128], index: 3, kind: input, shape index: {}]   ;;  %s1393_s4 = inlined_call_operand.vmem [shape: f32[8,128], index: 4, kind: input, shape index: {}]   ;;  %s1394_s5 = inlined_call_operand.hbm [shape: f32[8,128], index: 5, kind: output, shape index: {}]  }
   0x1   :  { %11 = vsyncpa [#allocation6], 0 }
   0x2   :  { %12 = vsyncpa [#allocation4], 0  ;;  %s1177_s18 = smov [#allocation2]  }
   0x3   :  { %s22_s19 = sshll.u32 %s1177_s18, 4  ;;  %s23_s19 = int_to_ptr.vmem [resolvable:$true] %s22_s19 }
   0x4   :  { %s1119_s20 = scalar_lea.vmem %s23_s19, 1024  ;;  %p1124_p1 = scmp.lt.s32.totalorder %s23_s19, %s23_s19 }
   0x5   :  { %p1120_p0 = scmp.ne.s32.totalorder %s23_s19, %s1119_s20  ;;  %p1125_p2 = scmp.lt.s32.totalorder %s1119_s20, %s1119_s20 }
   0x7   :  { %p1126_p3 = por %p1125_p2, %p1124_p1 }
   0x9   :  { %p1127_p4 = pnand %p1126_p3, %p1120_p0 }
   0xb   :  { %1130 = shalt.err (!%p1127_p4)
}
   0xc   :  { %s1178_s21 = smov 64   ;;  %s1179_s22 = smov 4  }
   0xd   :  { %28 = dma.hbm_to_vmem [thread:$0]  %s1391_s2, 1024, %s23_s19, [#allocation3], %s1178_s21, %s1178_s21, %s1179_s22  }
   0xe   :  { %s1180_s25 = smov [#allocation5]  }
   0xf   :  { %s34_s26 = sshll.u32 %s1180_s25, 4  ;;  %s35_s26 = int_to_ptr.vmem [resolvable:$true] %s34_s26 }
  0x10   :  { %s1139_s27 = scalar_lea.vmem %s35_s26, 4096  ;;  %p1144_p6 = scmp.lt.s32.totalorder %s35_s26, %s35_s26 }
  0x11   :  { %p1140_p5 = scmp.ne.s32.totalorder %s35_s26, %s1139_s27  ;;  %p1145_p7 = scmp.lt.s32.totalorder %s1139_s27, %s1139_s27 }
  0x13   :  { %p1146_p8 = por %p1145_p7, %p1144_p6 }
  0x15   :  { %p1147_p9 = pnand %p1146_p8, %p1140_p5 }
  0x17   :  { %1150 = shalt.err (!%p1147_p9)
}
  0x18   :  { %40 = dma.hbm_to_vmem [thread:$0]  %s1392_s3, 4096, %s35_s26, [#allocation6], %s1178_s21, %s1178_s21, %s1179_s22  }
  0x19   :  { %1171 = dma.done.wait [#allocation3], 1024  }
  0x1a   :  { %1172 = vsyncadd [#allocation3], 4294966272 }
  0x1b   :  { %1173 = dma.done.wait [#allocation6], 4096  }
  0x1c   :  { %1174 = vsyncadd [#allocation6], 4294963200  ;;  %v1181_v0 = vmov 1   ;;  %v1182_v1 = vmov 0.0   ;;  %v70_v2 = vld [vmem:[%s1389_s0] sm:$0xff]  ;;  %v1232_v4 = vld [vmem:[#allocation2 + $0x30] sm:$0xff]  }
  0x1d   :  { %1066 = vset.pattern.permute.xlu0 %v1181_v0  ;;  %915 = vmatprep.subr.bf16.mxu1 %v1182_v1  ;;  %v1229_v3 = vld [vmem:[#allocation2 + $0x38] sm:$0xff]   ;;  %v1183_v5 = vmov 0   ;;  %vm1184_vm0 = vmmov 0   ;;  %v1242_v6 = vld [vmem:[#allocation2 + $0x28] sm:$0xff]   ;;  %v1247_v7 = vld [vmem:[#allocation2 + $0x20] sm:$0xff]   ;;  %v1185_v8 = vmov 2  }
  0x1e   :  { %895 = vmatprep.subr.bf16.mxu0 %v1182_v1  ;;  %199 = vperm.xlu0 %1066, %v70_v2   ;;  %v1186_v9 = vmov 3   ;;  %v1254_v10 = vld [vmem:[#allocation2 + $0x18] sm:$0xff]   ;;  %v1260_v11 = vld [vmem:[#allocation2 + $0x10] sm:$0xff]   ;;  %v1266_v12 = vld [vmem:[#allocation2 + $0x8] sm:$0xff]   ;;  %s1187_s11 = smov [#allocation7]  }
  0x1f   :  { %916 = vmatpush3.bf16.msra.mxu1 %v1229_v3  ;;  %896 = vmatpush3.bf16.msra.mxu0 %v1229_v3  ;;  %v1272_v13 = vld [vmem:[#allocation2] sm:$0xff]   ;;  %v1284_v14 = vld [vmem:[%s1390_s1] ss:$0 sm:$0xff]  ;;  %v1289_v16 = vld [vmem:[%s1390_s1 + $0x1] ss:$0 sm:$0xff]  ;;  %s768_s12 = sshll.u32 %s1187_s11, 4  ;;  %s769_s12 = int_to_ptr.vmem [resolvable:$true] %s768_s12 }
  0x20   :  { %917 = vmatprep.subr.bf16.mxu1 %v1182_v1  ;;  %897 = vmatprep.subr.bf16.mxu0 %v1182_v1  ;;  %v1081_v22 = vld [vmem:[#allocation5 + $0x38] sm:$0xff]   ;;  %v1083_v26 = vld [vmem:[#allocation5 + $0x30] sm:$0xff]   ;;  %v1085_v29 = vld [vmem:[#allocation5 + $0x28] sm:$0xff]   ;;  %s1151_s13 = scalar_lea.vmem %s769_s12, 128  ;;  %p1156_p11 = scmp.lt.s32.totalorder %s769_s12, %s769_s12 }
  0x21   :  { %931 = vmatprep.mubr.msk.bf16.mxu1 %vm1184_vm0, %v1182_v1  ;;  %911 = vmatprep.mubr.msk.bf16.mxu0 %vm1184_vm0, %v1182_v1  ;;  %v1079_v27 = vld [vmem:[#allocation5 + $0x78] sm:$0xff]   ;;  %v1080_v30 = vld [vmem:[#allocation5 + $0x70] sm:$0xff]   ;;  %v1087_v31 = vld [vmem:[#allocation5 + $0x20] sm:$0xff]   ;;  %p1152_p10 = scmp.ne.s32.totalorder %s769_s12, %s1151_s13  ;;  %p1157_p12 = scmp.lt.s32.totalorder %s1151_s13, %s1151_s13 }
  0x22   :  { %1067 = vset.pattern.permute.xlu0 %v1183_v5  ;;  %1068 = vset.pattern.permute.xlu1 %v1185_v8  ;;  %v1082_v32 = vld [vmem:[#allocation5 + $0x68] sm:$0xff]   ;;  %v1089_v33 = vld [vmem:[#allocation5 + $0x18] sm:$0xff]   ;;  %v1084_v34 = vld [vmem:[#allocation5 + $0x60] sm:$0xff]  }
  0x23   :  { %73 = vperm.xlu0 %1067, %v70_v2   ;;  %918 = vmatpush3.bf16.msra.mxu1 %v1232_v4  ;;  %v1086_v35 = vld [vmem:[#allocation5 + $0x58] sm:$0xff]   ;;  %v1088_v36 = vld [vmem:[#allocation5 + $0x50] sm:$0xff]   ;;  %v1090_v37 = vld [vmem:[#allocation5 + $0x48] sm:$0xff]   ;;  %p1158_p13 = por %p1157_p12, %p1156_p11 }
  0x24   :  { %898 = vmatpush3.bf16.msra.mxu0 %v1232_v4  ;;  %919 = vmatprep.subr.bf16.mxu1 %v1182_v1  ;;  %v1091_v38 = vld [vmem:[#allocation5 + $0x10] sm:$0xff]   ;;  %v1092_v39 = vld [vmem:[#allocation5 + $0x40] sm:$0xff]   ;;  %v1093_v40 = vld [vmem:[#allocation5 + $0x8] sm:$0xff]  }
  0x25   :  { %899 = vmatprep.subr.bf16.mxu0 %v1182_v1  ;;  %442 = vperm.xlu1 %1068, %v70_v2   ;;  %v1094_v41 = vld [vmem:[#allocation5] sm:$0xff]   ;;  %v1318_v42 = vld [vmem:[%s1390_s1 + $0x2] ss:$0 sm:$0xff]  ;;  %v1096_v5 = vld [vmem:[#allocation5 + $0xb0] sm:$0xff]   ;;  %p1159_p0 = pnand %p1158_p13, %p1152_p10 }
  0x26   :  { %v1099_v8 = vld [vmem:[#allocation5 + $0x98] sm:$0xff]  }
  0x27   :  { %920 = vmatpush3.bf16.msra.mxu1 %v1242_v6  ;;  %1070 = vset.pattern.permute.xlu0 %v1186_v9 }
  0x28   :  { %900 = vmatpush3.bf16.msra.mxu0 %v1242_v6  ;;  %921 = vmatprep.subr.bf16.mxu1 %v1182_v1 }
  0x29   :  { %901 = vmatprep.subr.bf16.mxu0 %v1182_v1  ;;  %1069 = vset.pattern.permute.xlu1 %v1186_v9  ;;  %v1100_v9 = vld [vmem:[#allocation5 + $0x90] sm:$0xff]  }
  0x2a   :  { %598 = vperm.xlu1 %1069, %v70_v2  }
  0x2b   :  { %922 = vmatpush3.bf16.msra.mxu1 %v1247_v7 }
  0x2c   :  { %902 = vmatpush3.bf16.msra.mxu0 %v1247_v7  ;;  %923 = vmatprep.subr.bf16.mxu1 %v1182_v1 }
  0x2d   :  { %903 = vmatprep.subr.bf16.mxu0 %v1182_v1 }
  0x2f   :  { %924 = vmatpush3.bf16.msra.mxu1 %v1254_v10 }
  0x30   :  { %904 = vmatpush3.bf16.msra.mxu0 %v1254_v10  ;;  %925 = vmatprep.subr.bf16.mxu1 %v1182_v1 }
  0x31   :  { %905 = vmatprep.subr.bf16.mxu0 %v1182_v1 }
  0x33   :  { %926 = vmatpush3.bf16.msra.mxu1 %v1260_v11 }
  0x34   :  { %906 = vmatpush3.bf16.msra.mxu0 %v1260_v11  ;;  %927 = vmatprep.subr.bf16.mxu1 %v1182_v1 }
  0x35   :  { %907 = vmatprep.subr.bf16.mxu0 %v1182_v1 }
  0x37   :  { %928 = vmatpush3.bf16.msra.mxu1 %v1266_v12 }
  0x38   :  { %908 = vmatpush3.bf16.msra.mxu0 %v1266_v12  ;;  %929 = vmatprep.subr.bf16.mxu1 %v1182_v1 }
  0x39   :  { %909 = vmatprep.subr.bf16.mxu0 %v1182_v1 }
  0x3b   :  { %930 = vmatpush3.bf16.msra.mxu1 %v1272_v13 }
  0x3c   :  { %910 = vmatpush3.bf16.msra.mxu0 %v1272_v13  ;;  %955 = vmatprep.subr.bf16.mxu1 %v1182_v1 }
  0x3d   :  { %935 = vmatprep.subr.bf16.mxu0 %v1182_v1 }
  0x99   :  { %v200_v15 = vpop.permute.xlu0 %199 }
  0x9a   :  { %v202_v17 = vmul.f32 %v1284_v14, %v200_v15 }
  0x9c   :  { %v203_v18 = vadd.f32 %v1289_v16, %v202_v17 }
  0x9e   :  { %v204_v19 = vmax.f32 %v203_v18, 0.0  ;;  %v74_v20 = vpop.permute.xlu0 %73 }
  0x9f   :  { %v80_v21 = vmul.f32 %v1284_v14, %v74_v20 }
  0xa0   :  { %v205_v23 = vpack.c.bf16 %v204_v19, %v204_v19  ;;  %v443_v57 = vpop.permute.xlu1 %442 }
  0xa1   :  { %v85_v24 = vadd.f32 %v1289_v16, %v80_v21  ;;  %v445_v58 = vmul.f32 %v1284_v14, %v443_v57 }
  0xa2   :  { %932 = vmatmul.mubr.bf16.vlgmr.msra.gmra.mxu1 %v205_v23 }
  0xa3   :  { %v86_v25 = vmax.f32 %v85_v24, 0.0  ;;  %956 = vmatpush3.bf16.msra.mxu1 %v1081_v22  ;;  %971 = vmatprep.mubr.msk.bf16.mxu1 %vm1184_vm0, %v1182_v1  ;;  %v446_v59 = vadd.f32 %v1289_v16, %v445_v58 }
  0xa4   :  { %957 = vmatprep.subr.bf16.mxu1 %v1182_v1 }
  0xa5   :  { %v87_v28 = vpack.c.bf16 %v86_v25, %v86_v25  ;;  %v447_v60 = vmax.f32 %v446_v59, 0.0  ;;  %v599_v62 = vpop.permute.xlu1 %598 }
  0xa6   :  { %v601_v63 = vmul.f32 %v1284_v14, %v599_v62 }
  0xa7   :  { %912 = vmatmul.mubr.bf16.vlgmr.msra.gmra.mxu0 %v87_v28  ;;  %958 = vmatpush3.bf16.msra.mxu1 %v1083_v26  ;;  %v448_v61 = vpack.c.bf16 %v447_v60, %v447_v60  ;;  %v1103_v26 = vld [vmem:[#allocation5 + $0xf8] sm:$0xff]  }
  0xa8   :  { %936 = vmatpush3.bf16.msra.mxu0 %v1079_v27  ;;  %959 = vmatprep.subr.bf16.mxu1 %v1182_v1  ;;  %v602_v0 = vadd.f32 %v1289_v16, %v601_v63 }
  0xa9   :  { %937 = vmatprep.subr.bf16.mxu0 %v1182_v1  ;;  %951 = vmatprep.mubr.msk.bf16.mxu0 %vm1184_vm0, %v1182_v1 }
  0xaa   :  { %v603_v2 = vmax.f32 %v602_v0, 0.0 }
  0xab   :  { %960 = vmatpush3.bf16.msra.mxu1 %v1085_v29  ;;  %v1104_v29 = vld [vmem:[#allocation5 + $0xf0] sm:$0xff]  }
  0xac   :  { %938 = vmatpush3.bf16.msra.mxu0 %v1080_v30  ;;  %961 = vmatprep.subr.bf16.mxu1 %v1182_v1  ;;  %v1105_v30 = vld [vmem:[#allocation5 + $0xe8] sm:$0xff]  }
  0xad   :  { %939 = vmatprep.subr.bf16.mxu0 %v1182_v1 }
  0xaf   :  { %962 = vmatpush3.bf16.msra.mxu1 %v1087_v31  ;;  %v1106_v31 = vld [vmem:[#allocation5 + $0xe0] sm:$0xff]  }
  0xb0   :  { %940 = vmatpush3.bf16.msra.mxu0 %v1082_v32  ;;  %963 = vmatprep.subr.bf16.mxu1 %v1182_v1  ;;  %v1107_v32 = vld [vmem:[#allocation5 + $0xd8] sm:$0xff]  }
  0xb1   :  { %941 = vmatprep.subr.bf16.mxu0 %v1182_v1 }
  0xb3   :  { %964 = vmatpush3.bf16.msra.mxu1 %v1089_v33  ;;  %v1108_v33 = vld [vmem:[#allocation5 + $0xd0] sm:$0xff]  }
  0xb4   :  { %942 = vmatpush3.bf16.msra.mxu0 %v1084_v34  ;;  %965 = vmatprep.subr.bf16.mxu1 %v1182_v1  ;;  %v1109_v34 = vld [vmem:[#allocation5 + $0xc8] sm:$0xff]  }
  0xb5   :  { %943 = vmatprep.subr.bf16.mxu0 %v1182_v1 }
  0xb7   :  { %966 = vmatpush3.bf16.msra.mxu1 %v1091_v38 }
  0xb8   :  { %944 = vmatpush3.bf16.msra.mxu0 %v1086_v35  ;;  %967 = vmatprep.subr.bf16.mxu1 %v1182_v1 }
  0xb9   :  { %945 = vmatprep.subr.bf16.mxu0 %v1182_v1 }
  0xbb   :  { %968 = vmatpush3.bf16.msra.mxu1 %v1093_v40 }
  0xbc   :  { %946 = vmatpush3.bf16.msra.mxu0 %v1088_v36  ;;  %969 = vmatprep.subr.bf16.mxu1 %v1182_v1  ;;  %v1110_v36 = vld [vmem:[#allocation5 + $0xc0] sm:$0xff]  }
  0xbd   :  { %947 = vmatprep.subr.bf16.mxu0 %v1182_v1 }
  0xbf   :  { %970 = vmatpush3.bf16.msra.mxu1 %v1094_v41 }
  0xc0   :  { %948 = vmatpush3.bf16.msra.mxu0 %v1090_v37  ;;  %995 = vmatprep.subr.bf16.mxu1 %v1182_v1 }
  0xc1   :  { %949 = vmatprep.subr.bf16.mxu0 %v1182_v1 }
  0xc4   :  { %950 = vmatpush3.bf16.msra.mxu0 %v1092_v39 }
  0xc5   :  { %975 = vmatprep.subr.bf16.mxu0 %v1182_v1 }
 0x162   :  { %v240_v43 = vpop.f32.mrf.mxu1 }
 0x163   :  { %v241_v44 = vadd.f32 %v1318_v42, %v240_v43 }
 0x164   :  { %v933_v45 = vpop.f32.mrf.mxu1 }
 0x165   :  { %v246_v46 = vmax.f32 %v241_v44, 0.0 }
 0x166   :  { %v243_v47 = vpop.f32.mrf.mxu1 }
 0x167   :  { %v247_v48 = vpack.c.bf16 %v246_v46, %v246_v46  ;;  %v174_v49 = vpop.f32.mrf.mxu0 }
 0x168   :  { %v175_v50 = vadd.f32 %v1318_v42, %v174_v49  ;;  %v934_v51 = vpop.f32.mrf.mxu1  ;;  %v821_v49 = vld [vmem:[%s1393_s4] ss:$0 sm:$0xff] }
 0x169   :  { %952 = vmatmul.mubr.bf16.vlgmr.msra.gmra.mxu0 %v247_v48  ;;  %v913_v52 = vpop.f32.mrf.mxu0 }
 0x16a   :  { %v180_v53 = vmax.f32 %v175_v50, 0.0  ;;  %976 = vmatpush3.bf16.msra.mxu0 %v1229_v3  ;;  %991 = vmatprep.mubr.msk.bf16.mxu0 %vm1184_vm0, %v1182_v1 }
 0x16b   :  { %977 = vmatprep.subr.bf16.mxu0 %v1182_v1  ;;  %v177_v54 = vpop.f32.mrf.mxu0 }
 0x16c   :  { %v181_v55 = vpack.c.bf16 %v180_v53, %v180_v53 }
 0x16d   :  { %v914_v56 = vpop.f32.mrf.mxu0 }
 0x16e   :  { %978 = vmatpush3.bf16.msra.mxu0 %v1232_v4  ;;  %972 = vmatmul.mubr.bf16.vlgmr.msra.gmra.mxu1 %v181_v55 }
 0x16f   :  { %979 = vmatprep.subr.bf16.mxu0 %v1182_v1  ;;  %1011 = vmatprep.mubr.msk.bf16.mxu1 %vm1184_vm0, %v1182_v1 }
 0x172   :  { %980 = vmatpush3.bf16.msra.mxu0 %v1242_v6 }
 0x173   :  { %981 = vmatprep.subr.bf16.mxu0 %v1182_v1 }
 0x176   :  { %982 = vmatpush3.bf16.msra.mxu0 %v1247_v7 }
 0x177   :  { %983 = vmatprep.subr.bf16.mxu0 %v1182_v1 }
 0x17a   :  { %984 = vmatpush3.bf16.msra.mxu0 %v1254_v10 }
 0x17b   :  { %985 = vmatprep.subr.bf16.mxu0 %v1182_v1 }
 0x17e   :  { %986 = vmatpush3.bf16.msra.mxu0 %v1260_v11 }
 0x17f   :  { %987 = vmatprep.subr.bf16.mxu0 %v1182_v1 }
 0x182   :  { %988 = vmatpush3.bf16.msra.mxu0 %v1266_v12 }
 0x183   :  { %989 = vmatprep.subr.bf16.mxu0 %v1182_v1 }
 0x186   :  { %990 = vmatpush3.bf16.msra.mxu0 %v1272_v13 }
 0x187   :  { %1015 = vmatprep.subr.bf16.mxu0 %v1182_v1 }
 0x189   :  { %992 = vmatmul.mubr.bf16.vlgmr.msra.gmra.mxu0 %v448_v61 }
 0x18a   :  { %1016 = vmatpush3.bf16.msra.mxu0 %v1229_v3  ;;  %1031 = vmatprep.mubr.msk.bf16.mxu0 %vm1184_vm0, %v1182_v1  ;;  %v604_v3 = vpack.c.bf16 %v603_v2, %v603_v2 }
 0x18b   :  { %1017 = vmatprep.subr.bf16.mxu0 %v1182_v1 }
 0x18e   :  { %1018 = vmatpush3.bf16.msra.mxu0 %v1232_v4  ;;  %v1095_v4 = vld [vmem:[#allocation5 + $0xb8] sm:$0xff]  }
 0x18f   :  { %1019 = vmatprep.subr.bf16.mxu0 %v1182_v1  ;;  %996 = vmatpush3.bf16.msra.mxu1 %v1095_v4 }
 0x190   :  { %997 = vmatprep.subr.bf16.mxu1 %v1182_v1 }
 0x192   :  { %1020 = vmatpush3.bf16.msra.mxu0 %v1242_v6  ;;  %v1097_v6 = vld [vmem:[#allocation5 + $0xa8] sm:$0xff]  }
 0x193   :  { %1021 = vmatprep.subr.bf16.mxu0 %v1182_v1  ;;  %998 = vmatpush3.bf16.msra.mxu1 %v1096_v5 }
 0x194   :  { %999 = vmatprep.subr.bf16.mxu1 %v1182_v1 }
 0x196   :  { %1022 = vmatpush3.bf16.msra.mxu0 %v1247_v7  ;;  %v1098_v7 = vld [vmem:[#allocation5 + $0xa0] sm:$0xff]  }
 0x197   :  { %1023 = vmatprep.subr.bf16.mxu0 %v1182_v1  ;;  %1000 = vmatpush3.bf16.msra.mxu1 %v1097_v6 }
 0x198   :  { %1001 = vmatprep.subr.bf16.mxu1 %v1182_v1 }
 0x19a   :  { %1024 = vmatpush3.bf16.msra.mxu0 %v1254_v10  ;;  %v1101_v10 = vld [vmem:[#allocation5 + $0x88] sm:$0xff]  }
 0x19b   :  { %1025 = vmatprep.subr.bf16.mxu0 %v1182_v1  ;;  %1002 = vmatpush3.bf16.msra.mxu1 %v1098_v7 }
 0x19c   :  { %1003 = vmatprep.subr.bf16.mxu1 %v1182_v1 }
 0x19e   :  { %1026 = vmatpush3.bf16.msra.mxu0 %v1260_v11  ;;  %v1102_v11 = vld [vmem:[#allocation5 + $0x80] sm:$0xff]  }
 0x19f   :  { %1027 = vmatprep.subr.bf16.mxu0 %v1182_v1  ;;  %1004 = vmatpush3.bf16.msra.mxu1 %v1099_v8 }
 0x1a0   :  { %1005 = vmatprep.subr.bf16.mxu1 %v1182_v1 }
 0x1a2   :  { %1028 = vmatpush3.bf16.msra.mxu0 %v1266_v12 }
 0x1a3   :  { %1029 = vmatprep.subr.bf16.mxu0 %v1182_v1  ;;  %1006 = vmatpush3.bf16.msra.mxu1 %v1100_v9 }
 0x1a4   :  { %1007 = vmatprep.subr.bf16.mxu1 %v1182_v1 }
 0x1a6   :  { %1030 = vmatpush3.bf16.msra.mxu0 %v1272_v13 }
 0x1a7   :  { %1008 = vmatpush3.bf16.msra.mxu1 %v1101_v10 }
 0x1a8   :  { %1009 = vmatprep.subr.bf16.mxu1 %v1182_v1 }
 0x1a9   :  { %1032 = vmatmul.mubr.bf16.vlgmr.msra.gmra.mxu0 %v604_v3 }
 0x1ab   :  { %1010 = vmatpush3.bf16.msra.mxu1 %v1102_v11 }
 0x1ac   :  { %1035 = vmatprep.subr.bf16.mxu1 %v1182_v1 }
 0x229   :  { %v347_v12 = vpop.f32.mrf.mxu0 }
 0x22b   :  { %v953_v13 = vpop.f32.mrf.mxu0 }
 0x22d   :  { %v350_v14 = vpop.f32.mrf.mxu0 }
 0x22e   :  { %v435_v15 = vpop.f32.mrf.mxu1 }
 0x22f   :  { %v436_v16 = vadd.f32 %v435_v15, %v347_v12  ;;  %v954_v17 = vpop.f32.mrf.mxu0 }
 0x230   :  { %v973_v18 = vpop.f32.mrf.mxu1 }
 0x232   :  { %v438_v19 = vpop.f32.mrf.mxu1 }
 0x234   :  { %v974_v20 = vpop.f32.mrf.mxu1 }
 0x249   :  { %v483_v21 = vpop.f32.mrf.mxu0 }
 0x24a   :  { %v484_v22 = vadd.f32 %v1318_v42, %v483_v21 }
 0x24b   :  { %v993_v23 = vpop.f32.mrf.mxu0 }
 0x24c   :  { %v489_v24 = vmax.f32 %v484_v22, 0.0 }
 0x24d   :  { %v486_v25 = vpop.f32.mrf.mxu0 }
 0x24e   :  { %v490_v27 = vpack.c.bf16 %v489_v24, %v489_v24 }
 0x24f   :  { %v994_v28 = vpop.f32.mrf.mxu0 }
 0x250   :  { %1012 = vmatmul.mubr.bf16.vlgmr.msra.gmra.mxu1 %v490_v27 }
 0x251   :  { %1036 = vmatpush3.bf16.msra.mxu1 %v1103_v26  ;;  %1051 = vmatprep.mubr.msk.bf16.mxu1 %vm1184_vm0, %v1182_v1 }
 0x252   :  { %1037 = vmatprep.subr.bf16.mxu1 %v1182_v1 }
 0x255   :  { %1038 = vmatpush3.bf16.msra.mxu1 %v1104_v29 }
 0x256   :  { %1039 = vmatprep.subr.bf16.mxu1 %v1182_v1 }
 0x259   :  { %1040 = vmatpush3.bf16.msra.mxu1 %v1105_v30 }
 0x25a   :  { %1041 = vmatprep.subr.bf16.mxu1 %v1182_v1 }
 0x25d   :  { %1042 = vmatpush3.bf16.msra.mxu1 %v1106_v31 }
 0x25e   :  { %1043 = vmatprep.subr.bf16.mxu1 %v1182_v1 }
 0x261   :  { %1044 = vmatpush3.bf16.msra.mxu1 %v1107_v32 }
 0x262   :  { %1045 = vmatprep.subr.bf16.mxu1 %v1182_v1 }
 0x265   :  { %1046 = vmatpush3.bf16.msra.mxu1 %v1108_v33 }
 0x266   :  { %1047 = vmatprep.subr.bf16.mxu1 %v1182_v1 }
 0x269   :  { %v639_v35 = vpop.f32.mrf.mxu0  ;;  %1048 = vmatpush3.bf16.msra.mxu1 %v1109_v34 }
 0x26a   :  { %v640_v37 = vadd.f32 %v1318_v42, %v639_v35  ;;  %1049 = vmatprep.subr.bf16.mxu1 %v1182_v1 }
 0x26b   :  { %v1033_v38 = vpop.f32.mrf.mxu0 }
 0x26c   :  { %v645_v39 = vmax.f32 %v640_v37, 0.0 }
 0x26d   :  { %v642_v40 = vpop.f32.mrf.mxu0  ;;  %1050 = vmatpush3.bf16.msra.mxu1 %v1110_v36 }
 0x26e   :  { %v646_v41 = vpack.c.bf16 %v645_v39, %v645_v39 }
 0x26f   :  { %v1034_v43 = vpop.f32.mrf.mxu0 }
 0x270   :  { %1052 = vmatmul.mubr.bf16.vlgmr.msra.gmra.mxu1 %v646_v41 }
 0x310   :  { %v590_v44 = vpop.f32.mrf.mxu1 }
 0x311   :  { %v596_v48 = vadd.f32 %v590_v44, %v436_v16 }
 0x312   :  { %v1013_v45 = vpop.f32.mrf.mxu1 }
 0x314   :  { %v593_v46 = vpop.f32.mrf.mxu1 }
 0x316   :  { %v1014_v47 = vpop.f32.mrf.mxu1 }
 0x330   :  { %v746_v50 = vpop.f32.mrf.mxu1 }
 0x331   :  { %v752_v42 = vadd.f32 %v746_v50, %v596_v48 }
 0x332   :  { %v1053_v51 = vpop.f32.mrf.mxu1 }
 0x333   :  { %v757_v52 = vadd.f32 %v821_v49, %v752_v42 }
 0x334   :  { %v749_v53 = vpop.f32.mrf.mxu1 }
 0x335   :  { %vm758_vm1 = vcmp.gt.f32.partialorder %v757_v52, 0.0 }
 0x336   :  { %v1054_v54 = vpop.f32.mrf.mxu1  ;;  %v822_v55 = vsel %vm758_vm1, 1.0, %v1182_v1 }
 0x337   :  { %761 = vst [vmem:[#allocation7] sm:$0xff] %v822_v55 }
 0x338   :  { %1162 = shalt.err (!%p1159_p0)
}
 0x339   :  { %771 = dma.vmem_to_hbm [thread:$0]  %s769_s12, 128, %s1394_s5, [#allocation4]  }
 0x33a   :  { %1175 = dma.done.wait [#allocation4], 128  }
 0x33b   :  { %1176 = vsyncadd [#allocation4], 4294967168 }
 0x33c   :  { %775 = vsyncpa [#allocation3], 1 }
 0x33d   :  { %776 = vsyncpa [#allocation6], 1 }
 0x33e   :  { %777 = vsyncpa [#allocation4], 1 }

</bundles_post_ra>
